<compile_context>
chip_gen: v6e
topology: v6e:2x2x1
jax: 0.10.0
libtpu: 0.0.40
codegen_flags: <defaults>
</compile_context>

<pallas_src>
import jax
import jax.numpy as jnp
from jax.experimental import pallas as pl
from jax.experimental.pallas import tpu as pltpu

BN_EPS = 1e-5
LEAKY_SLOPE = 0.01
D1, D2 = 128, 32  # MLP head widths (lin1 out, lin2 out) from the module spec


def _leaky_relu(x):
    return jnp.where(x > 0, x, LEAKY_SLOPE * x)


def _make_kernel(num_features, hidden):
    F = num_features
    H = hidden

    def kernel(a_ref, p_ref, pa_ref, x_ref, cb5_ref,
               wgc_ref, whead_ref, bias_ref, out_ref):
        # Per-instance refs (leading batch axis squeezed by the BlockSpec):
        #   a_ref [N,N] bf16, p_ref [G,N] bf16, pa_ref [G,N] bf16, x_ref [N,F] bf16,
        #   cb5_ref [G,H] f32 (= counts * b_rel5).
        # Shared weight refs (sliced lazily at use sites; never fully materialized):
        #   wgc_ref  [2F+8H, H] bf16 : per-layer [W_rel ; W_root] row blocks
        #                              (W_root5 has +I folded in).
        #   whead_ref [H+D1+D2,128] bf16 : BN-folded lin1 / lin2, lin3.
        #   bias_ref [8,128] f32 : rows 0-3 b_rel1..4, 4 folded b1, 5 folded b2, 6 b3.
        A = a_ref[...]                                   # [N, N] bf16 (small; reused 4x)

        def dotf(a, b):
            return jnp.dot(a, b, preferred_element_type=jnp.float32)

        def gconv(h_bf, off, in_dim, b_row):
            # (A@h)@W_rel + h@W_root + b_rel. Split dots: the root matmul has no
            # dependence on A@h, so both MXU chains can issue concurrently.
            agg = dotf(A, h_bf).astype(jnp.bfloat16)                       # [N, in]
            rel = dotf(agg, wgc_ref[off:off + in_dim, :])                  # [N, H] f32
            root = dotf(h_bf, wgc_ref[off + in_dim:off + 2 * in_dim, :])   # [N, H] f32
            return rel + root + b_row

        # GNN with residuals (exactly as GNN.forward); elementwise math in f32.
        x0 = x_ref[...]                                                    # [N, F] bf16
        h1 = jax.nn.relu(gconv(x0, 0, F, bias_ref[0:1, 0:H]))
        h1b = h1.astype(jnp.bfloat16)
        h2 = jax.nn.relu(gconv(h1b, 2 * F, H, bias_ref[1:2, 0:H])) + h1
        h2b = h2.astype(jnp.bfloat16)
        h3 = jax.nn.relu(gconv(h2b, 2 * F + 2 * H, H, bias_ref[2:3, 0:H])) + h2
        h3b = h3.astype(jnp.bfloat16)
        h4 = jax.nn.relu(gconv(h3b, 2 * F + 4 * H, H, bias_ref[3:4, 0:H])) + h3
        h4b = h4.astype(jnp.bfloat16)

        # Layer 5 + global_add_pool, pooled-first with host-side folds:
        #   pooled = (P@A@x4)@W_rel5 + (P@x4)@(W_root5 + I) + counts*b_rel5
        # PA and cb5 precomputed host-side; the two [G,*] matmuls are independent.
        off5 = 2 * F + 6 * H
        p_agg = dotf(pa_ref[...], h4b).astype(jnp.bfloat16)                # [G, H]
        p_x4 = dotf(p_ref[...], h4b).astype(jnp.bfloat16)                  # [G, H]
        pooled = (dotf(p_agg, wgc_ref[off5:off5 + H, :])
                  + dotf(p_x4, wgc_ref[off5 + H:off5 + 2 * H, :])
                  + cb5_ref[...])                                          # [G, H] f32

        # MLP head; BatchNorm (eval) folded into weights/biases, Dropout is identity.
        h = _leaky_relu(dotf(pooled.astype(jnp.bfloat16), whead_ref[0:H, :])
                        + bias_ref[4:5, 0:D1])
        h = _leaky_relu(dotf(h.astype(jnp.bfloat16), whead_ref[H:H + D1, 0:D2])
                        + bias_ref[5:6, 0:D2])
        out = (dotf(h.astype(jnp.bfloat16), whead_ref[H + D1:H + D1 + D2, 0:1])
               + bias_ref[6:7, 0:1])                                       # [G, 1]
        out_ref[...] = out.astype(out_ref.dtype)

    return kernel


def pack_params(params, num_features, hidden):
    """Pack PyTorch-shaped parameters into TPU-friendly slabs.

    Returns:
      wgc_slab  [2F+8H, H] bf16: per-layer [W_rel ; W_root] row blocks; W_root5 has
                                 the identity folded in (absorbs the +x4 residual
                                 through the pooling).
      head_slab [H+D1+D2, 128] bf16: BN-folded lin1 (rows 0:H), BN-folded lin2
                                     (rows H:H+D1, cols 0:D2), lin3 (rows H+D1:, col 0).
      bias_slab [8, 128] f32: rows 0-3 b_rel1..4, row 4 folded b1, row 5 folded b2,
                              row 6 b3. (b_rel5 returned separately; it is folded
                              per-instance as counts * b_rel5.)
      b_rel5    [1, H] f32.
    """
    p = list(params)
    gcs = [(p[3 * i], p[3 * i + 1], p[3 * i + 2]) for i in range(5)]  # (w_rel, b_rel, w_root)
    (w1, b1, g1, be1, rm1, rv1,
     w2, b2, g2, be2, rm2, rv2,
     w3, b3) = p[15:]
    H = hidden

    blocks = []
    for li, (wr, br, wq) in enumerate(gcs):
        if li == 4:
            wq = wq + jnp.eye(H, dtype=wq.dtype)   # fold the final +x4 residual
        blocks.append(wr)
        blocks.append(wq)
    wgc_slab = jnp.concatenate(blocks, axis=0).astype(jnp.bfloat16)

    # Fold BatchNorm (eval mode) into lin1 / lin2 (in f32, then cast).
    s1 = g1 / jnp.sqrt(rv1 + BN_EPS)            # [1, 128]
    w1p = w1 * s1                               # [H, 128]
    b1p = (b1 - rm1) * s1 + be1                 # [1, 128]
    s2 = g2 / jnp.sqrt(rv2 + BN_EPS)            # [1, 32]
    w2p = w2 * s2                               # [128, 32]
    b2p = (b2 - rm2) * s2 + be2                 # [1, 32]

    head_slab = jnp.zeros((H + D1 + D2, 128), jnp.float32)
    head_slab = head_slab.at[0:H, :].set(w1p)
    head_slab = head_slab.at[H:H + D1, 0:D2].set(w2p)
    head_slab = head_slab.at[H + D1:H + D1 + D2, 0:1].set(w3)
    head_slab = head_slab.astype(jnp.bfloat16)

    bias_slab = jnp.zeros((8, 128), jnp.float32)
    for i in range(4):
        bias_slab = bias_slab.at[i, 0:H].set(gcs[i][1][0])
    bias_slab = bias_slab.at[4, 0:D1].set(b1p[0])
    bias_slab = bias_slab.at[5, 0:D2].set(b2p[0])
    bias_slab = bias_slab.at[6, 0:1].set(b3[0])

    b_rel5 = gcs[4][1]                          # [1, H] f32
    return wgc_slab, head_slab, bias_slab, b_rel5


def latency_model_forward(A, P, x, wgc_slab, head_slab, bias_slab, b_rel5):
    """Run LatencyModel forward for a batch of B independent graph-batch instances.

    A: [B,N,N] f32 dense adjacency (A[dst,src] = #edges), P: [B,G,N] f32 one-hot
    pooling matrices, x: [B,N,F] f32 node features. Returns [B,G,1] f32.
    """
    B, N, _ = A.shape
    G = P.shape[1]
    F = x.shape[2]
    H = wgc_slab.shape[1]

    # Tiny activation-independent host-side folds (chain-shortening):
    PA = jnp.einsum('bgn,bnm->bgm', P, A)                # [B,G,N]  P @ A
    counts = jnp.sum(P, axis=-1, keepdims=True)          # [B,G,1]  nodes per graph
    cb5 = counts * b_rel5[None]                          # [B,G,H]  counts * b_rel5

    # bf16 matmul operands (A / P / PA entries are small integers -> exact in bf16).
    A_bf = A.astype(jnp.bfloat16)
    P_bf = P.astype(jnp.bfloat16)
    PA_bf = PA.astype(jnp.bfloat16)
    x_bf = x.astype(jnp.bfloat16)

    kernel = _make_kernel(F, H)
    inputs = [A_bf, P_bf, PA_bf, x_bf, cb5, wgc_slab, head_slab, bias_slab]

    def shared_spec(arr):
        nd = arr.ndim
        return pl.BlockSpec(arr.shape, lambda b, _nd=nd: (0,) * _nd)

    in_specs = [
        pl.BlockSpec((None, N, N), lambda b: (b, 0, 0)),   # A
        pl.BlockSpec((None, G, N), lambda b: (b, 0, 0)),   # P
        pl.BlockSpec((None, G, N), lambda b: (b, 0, 0)),   # PA
        pl.BlockSpec((None, N, F), lambda b: (b, 0, 0)),   # x
        pl.BlockSpec((None, G, H), lambda b: (b, 0, 0)),   # counts*b_rel5
        shared_spec(wgc_slab),                             # weights stay resident
        shared_spec(head_slab),
        shared_spec(bias_slab),
    ]

    # Advisory cost estimate (scheduling hint only).
    flops_inst = 2 * (N * N * F + 2 * N * F * H)               # conv1
    flops_inst += 3 * 2 * (N * N * H + 2 * N * H * H)          # conv2-4
    flops_inst += 2 * (2 * G * N * H + 2 * G * H * H)          # conv5 (pooled-first)
    flops_inst += 2 * (G * H * D1 + G * D1 * D2 + G * D2 * 1)  # MLP head
    flops = int(B * flops_inst)
    bytes_accessed = int(sum(int(a.size) * a.dtype.itemsize for a in inputs) + B * G * 4)

    return pl.pallas_call(
        kernel,
        out_shape=jax.ShapeDtypeStruct((B, G, 1), jnp.float32),
        grid=(B,),
        in_specs=in_specs,
        out_specs=pl.BlockSpec((None, G, 1), lambda b: (b, 0, 0)),
        compiler_params=pltpu.CompilerParams(
            dimension_semantics=("parallel",),   # shards instances across v7x's 2 TCs
        ),
        cost_estimate=pl.CostEstimate(
            flops=flops, transcendentals=0, bytes_accessed=bytes_accessed),
    )(*inputs)


def make_params(key, num_features, hidden):
    """Deterministic synthetic parameters matching the PyTorch module shapes.

    Linear / GraphConv weights are stored pre-transposed as [in, out]
    (PyTorch keeps [out, in]); biases / BN params as [1, out]."""
    keys = jax.random.split(key, 32)
    ki = iter(range(32))

    def lin_w(in_dim, out_dim):
        k = keys[next(ki)]
        scale = 1.0 / jnp.sqrt(jnp.float32(in_dim))
        return jax.random.uniform(k, (in_dim, out_dim), jnp.float32, -scale, scale)

    def lin_b(in_dim, out_dim):
        k = keys[next(ki)]
        scale = 1.0 / jnp.sqrt(jnp.float32(in_dim))
        return jax.random.uniform(k, (1, out_dim), jnp.float32, -scale, scale)

    params = []
    # 5 GraphConv layers: (w_rel, b_rel, w_root)
    dims = [(num_features, hidden)] + [(hidden, hidden)] * 4
    for d_in, d_out in dims:
        params.append(lin_w(d_in, d_out))   # w_rel
        params.append(lin_b(d_in, d_out))   # b_rel
        params.append(lin_w(d_in, d_out))   # w_root (no bias)

    # lin1 + bn1
    params.append(lin_w(hidden, 128))
    params.append(lin_b(hidden, 128))
    params.append(jnp.ones((1, 128), jnp.float32))    # gamma
    params.append(jnp.zeros((1, 128), jnp.float32))   # beta
    params.append(jnp.zeros((1, 128), jnp.float32))   # running_mean
    params.append(jnp.ones((1, 128), jnp.float32))    # running_var
    # lin2 + bn2
    params.append(lin_w(128, 32))
    params.append(lin_b(128, 32))
    params.append(jnp.ones((1, 32), jnp.float32))
    params.append(jnp.zeros((1, 32), jnp.float32))
    params.append(jnp.zeros((1, 32), jnp.float32))
    params.append(jnp.ones((1, 32), jnp.float32))
    # lin3
    params.append(lin_w(32, 1))
    params.append(lin_b(32, 1))
    return params


def _reference_single(A, P, x, params):
    """Pure-JAX f32 reference for one instance (unpacked params, unfolded BN)."""
    p = list(params)
    gcs = [(p[3 * i], p[3 * i + 1], p[3 * i + 2]) for i in range(5)]
    (w1, b1, g1, be1, rm1, rv1,
     w2, b2, g2, be2, rm2, rv2,
     w3, b3) = p[15:]

    def gc(h, wr, br, wq):
        return (A @ h) @ wr + br + h @ wq

    x1 = jax.nn.relu(gc(x, *gcs[0]))
    x2 = jax.nn.relu(gc(x1, *gcs[1])) + x1
    x3 = jax.nn.relu(gc(x2, *gcs[2])) + x2
    x4 = jax.nn.relu(gc(x3, *gcs[3])) + x3
    x5 = gc(x4, *gcs[4]) + x4
    h = P @ x5

    def bn(h, g, be, rm, rv):
        return (h - rm) / jnp.sqrt(rv + BN_EPS) * g + be

    h = jax.nn.leaky_relu(bn(h @ w1 + b1, g1, be1, rm1, rv1), LEAKY_SLOPE)
    h = jax.nn.leaky_relu(bn(h @ w2 + b2, g2, be2, rm2, rv2), LEAKY_SLOPE)
    return h @ w3 + b3


def reference_forward(A, P, x, params):
    return jnp.stack([_reference_single(A[b], P[b], x[b], params)
                      for b in range(A.shape[0])])


if __name__ == "__main__":
    key = jax.random.PRNGKey(0)
    k_inst, k_params = jax.random.split(key)

    # Small shapes consistent with the module.
    B = 2             # independent graph-batch instances (parallel grid axis)
    N = 16            # number of 'link' nodes (total across graphs) per instance
    NUM_FEATURES = 8  # num_features
    HIDDEN = 32       # hidden_channels
    G = 2             # number of graphs in each batch
    E = 48            # number of ('link','to','link') edges

    A_list, P_list, x_list = [], [], []
    inst_keys = jax.random.split(k_inst, B)
    for b in range(B):
        k_x, k_src, k_dst = jax.random.split(inst_keys[b], 3)
        # x_dict['link']
        x_list.append(jax.random.normal(k_x, (N, NUM_FEATURES), jnp.float32))
        # edge_index_dict[('link','to','link')] -> dense adjacency A[dst, src] = #edges
        src = jax.random.randint(k_src, (E,), 0, N)
        dst = jax.random.randint(k_dst, (E,), 0, N)
        A_list.append(jnp.zeros((N, N), jnp.float32).at[dst, src].add(1.0))
        # batch_dict: first half of the nodes -> graph 0, second half -> graph 1
        batch = jnp.concatenate([jnp.zeros((N // 2,), jnp.int32),
                                 jnp.ones((N - N // 2,), jnp.int32)])
        P_list.append((batch[None, :] ==
                       jnp.arange(G, dtype=jnp.int32)[:, None]).astype(jnp.float32))

    A = jnp.stack(A_list)
    P = jnp.stack(P_list)
    x = jnp.stack(x_list)

    params = make_params(k_params, NUM_FEATURES, HIDDEN)
    wgc_slab, head_slab, bias_slab, b_rel5 = pack_params(params, NUM_FEATURES, HIDDEN)

    out = latency_model_forward(A, P, x, wgc_slab, head_slab, bias_slab, b_rel5)
    out = jax.block_until_ready(out)

    ref = reference_forward(A, P, x, params)
    assert out.shape == (B, G, 1)
    # Kernel uses bf16 matmul operands (f32 accumulation) -> tolerance relaxed
    # vs the f32 reference, as anticipated in the performance review.
    assert jnp.allclose(out, ref, atol=1e-1, rtol=5e-2), (out, ref)

    print("KERNEL_OK")
</pallas_src>

<mosaic_0001>
module attributes {stable_mosaic.version = 11 : i64} {
  func.func @kernel(%arg0: i32, %arg1: memref<1x16x16xbf16, #tpu.memory_space<vmem>>, %arg2: memref<1x2x16xbf16, #tpu.memory_space<vmem>>, %arg3: memref<1x2x16xbf16, #tpu.memory_space<vmem>>, %arg4: memref<1x16x8xbf16, #tpu.memory_space<vmem>>, %arg5: memref<1x2x32xf32, #tpu.memory_space<vmem>>, %arg6: memref<272x32xbf16, #tpu.memory_space<vmem>>, %arg7: memref<192x128xbf16, #tpu.memory_space<vmem>>, %arg8: memref<8x128xf32, #tpu.memory_space<vmem>>, %arg9: memref<1x2x1xf32, #tpu.memory_space<vmem>>) attributes {dimension_semantics = [#tpu.dimension_semantics<parallel>], iteration_bounds = array<i64: 2>, scalar_prefetch = 0 : i64, scratch_operands = 0 : i64, tpu.core_type = #tpu.core_type<tc>, window_params = [{transform_indices = @transform_0, window_bounds = array<i64: 1, 16, 16>}, {transform_indices = @transform_1, window_bounds = array<i64: 1, 2, 16>}, {transform_indices = @transform_2, window_bounds = array<i64: 1, 2, 16>}, {transform_indices = @transform_3, window_bounds = array<i64: 1, 16, 8>}, {transform_indices = @transform_4, window_bounds = array<i64: 1, 2, 32>}, {pipeline_mode = #tpu.pipeline_mode<synchronous>, transform_indices = @transform_5, window_bounds = array<i64: 272, 32>}, {pipeline_mode = #tpu.pipeline_mode<synchronous>, transform_indices = @transform_6, window_bounds = array<i64: 192, 128>}, {pipeline_mode = #tpu.pipeline_mode<synchronous>, transform_indices = @transform_7, window_bounds = array<i64: 8, 128>}, {transform_indices = @transform_8, window_bounds = array<i64: 1, 2, 1>}]} {
    %c0 = arith.constant 0 : index
    %c0_0 = arith.constant 0 : index
    %c0_1 = arith.constant 0 : index
    %0 = vector.load %arg1[%c0, %c0_0, %c0_1] : memref<1x16x16xbf16, #tpu.memory_space<vmem>>, vector<1x16x16xbf16>
    %1 = vector.shape_cast %0 : vector<1x16x16xbf16> to vector<16x16xbf16>
    %c0_2 = arith.constant 0 : index
    %c0_3 = arith.constant 0 : index
    %c0_4 = arith.constant 0 : index
    %2 = vector.load %arg4[%c0_2, %c0_3, %c0_4] : memref<1x16x8xbf16, #tpu.memory_space<vmem>>, vector<1x16x8xbf16>
    %3 = vector.shape_cast %2 : vector<1x16x8xbf16> to vector<16x8xbf16>
    %c0_5 = arith.constant 0 : index
    %c0_6 = arith.constant 0 : index
    %4 = vector.load %arg8[%c0_5, %c0_6] : memref<8x128xf32, #tpu.memory_space<vmem>>, vector<1x32xf32>
    %cst = arith.constant dense<0.000000e+00> : vector<16x8xf32>
    %5 = tpu.matmul %1, %3, %cst {dimension_numbers = #tpu.dot_dimension_numbers<[1], [0], [0], [1], [0, 0, 1, 1], [], []>} : vector<16x16xbf16>, vector<16x8xbf16>, vector<16x8xf32> -> vector<16x8xf32>
    %6 = arith.truncf %5 : vector<16x8xf32> to vector<16x8xbf16>
    %c0_7 = arith.constant 0 : index
    %c0_8 = arith.constant 0 : index
    %7 = vector.load %arg6[%c0_7, %c0_8] : memref<272x32xbf16, #tpu.memory_space<vmem>>, vector<8x32xbf16>
    %cst_9 = arith.constant dense<0.000000e+00> : vector<16x32xf32>
    %8 = tpu.matmul %6, %7, %cst_9 {dimension_numbers = #tpu.dot_dimension_numbers<[1], [0], [0], [1], [0, 0, 1, 1], [], []>} : vector<16x8xbf16>, vector<8x32xbf16>, vector<16x32xf32> -> vector<16x32xf32>
    %c8 = arith.constant 8 : index
    %c0_10 = arith.constant 0 : index
    %9 = vector.load %arg6[%c8, %c0_10] : memref<272x32xbf16, #tpu.memory_space<vmem>>, vector<8x32xbf16>
    %cst_11 = arith.constant dense<0.000000e+00> : vector<16x32xf32>
    %10 = tpu.matmul %3, %9, %cst_11 {dimension_numbers = #tpu.dot_dimension_numbers<[1], [0], [0], [1], [0, 0, 1, 1], [], []>} : vector<16x8xbf16>, vector<8x32xbf16>, vector<16x32xf32> -> vector<16x32xf32>
    %11 = arith.addf %8, %10 : vector<16x32xf32>
    %12 = vector.broadcast %4 : vector<1x32xf32> to vector<16x32xf32>
    %13 = arith.addf %11, %12 : vector<16x32xf32>
    %cst_12 = arith.constant 0.000000e+00 : f32
    %14 = vector.broadcast %cst_12 : f32 to vector<16x32xf32>
    %15 = arith.maximumf %13, %14 : vector<16x32xf32>
    %16 = arith.truncf %15 : vector<16x32xf32> to vector<16x32xbf16>
    %c1 = arith.constant 1 : index
    %c0_13 = arith.constant 0 : index
    %17 = vector.load %arg8[%c1, %c0_13] : memref<8x128xf32, #tpu.memory_space<vmem>>, vector<1x32xf32>
    %cst_14 = arith.constant dense<0.000000e+00> : vector<16x32xf32>
    %18 = tpu.matmul %1, %16, %cst_14 {dimension_numbers = #tpu.dot_dimension_numbers<[1], [0], [0], [1], [0, 0, 1, 1], [], []>} : vector<16x16xbf16>, vector<16x32xbf16>, vector<16x32xf32> -> vector<16x32xf32>
    %19 = arith.truncf %18 : vector<16x32xf32> to vector<16x32xbf16>
    %c16 = arith.constant 16 : index
    %c0_15 = arith.constant 0 : index
    %20 = vector.load %arg6[%c16, %c0_15] : memref<272x32xbf16, #tpu.memory_space<vmem>>, vector<32x32xbf16>
    %cst_16 = arith.constant dense<0.000000e+00> : vector<16x32xf32>
    %21 = tpu.matmul %19, %20, %cst_16 {dimension_numbers = #tpu.dot_dimension_numbers<[1], [0], [0], [1], [0, 0, 1, 1], [], []>} : vector<16x32xbf16>, vector<32x32xbf16>, vector<16x32xf32> -> vector<16x32xf32>
    %c48 = arith.constant 48 : index
    %c0_17 = arith.constant 0 : index
    %22 = vector.load %arg6[%c48, %c0_17] : memref<272x32xbf16, #tpu.memory_space<vmem>>, vector<32x32xbf16>
    %cst_18 = arith.constant dense<0.000000e+00> : vector<16x32xf32>
    %23 = tpu.matmul %16, %22, %cst_18 {dimension_numbers = #tpu.dot_dimension_numbers<[1], [0], [0], [1], [0, 0, 1, 1], [], []>} : vector<16x32xbf16>, vector<32x32xbf16>, vector<16x32xf32> -> vector<16x32xf32>
    %24 = arith.addf %21, %23 : vector<16x32xf32>
    %25 = vector.broadcast %17 : vector<1x32xf32> to vector<16x32xf32>
    %26 = arith.addf %24, %25 : vector<16x32xf32>
    %cst_19 = arith.constant 0.000000e+00 : f32
    %27 = vector.broadcast %cst_19 : f32 to vector<16x32xf32>
    %28 = arith.maximumf %26, %27 : vector<16x32xf32>
    %29 = arith.addf %28, %15 : vector<16x32xf32>
    %30 = arith.truncf %29 : vector<16x32xf32> to vector<16x32xbf16>
    %c2 = arith.constant 2 : index
    %c0_20 = arith.constant 0 : index
    %31 = vector.load %arg8[%c2, %c0_20] : memref<8x128xf32, #tpu.memory_space<vmem>>, vector<1x32xf32>
    %cst_21 = arith.constant dense<0.000000e+00> : vector<16x32xf32>
    %32 = tpu.matmul %1, %30, %cst_21 {dimension_numbers = #tpu.dot_dimension_numbers<[1], [0], [0], [1], [0, 0, 1, 1], [], []>} : vector<16x16xbf16>, vector<16x32xbf16>, vector<16x32xf32> -> vector<16x32xf32>
    %33 = arith.truncf %32 : vector<16x32xf32> to vector<16x32xbf16>
    %c80 = arith.constant 80 : index
    %c0_22 = arith.constant 0 : index
    %34 = vector.load %arg6[%c80, %c0_22] : memref<272x32xbf16, #tpu.memory_space<vmem>>, vector<32x32xbf16>
    %cst_23 = arith.constant dense<0.000000e+00> : vector<16x32xf32>
    %35 = tpu.matmul %33, %34, %cst_23 {dimension_numbers = #tpu.dot_dimension_numbers<[1], [0], [0], [1], [0, 0, 1, 1], [], []>} : vector<16x32xbf16>, vector<32x32xbf16>, vector<16x32xf32> -> vector<16x32xf32>
    %c112 = arith.constant 112 : index
    %c0_24 = arith.constant 0 : index
    %36 = vector.load %arg6[%c112, %c0_24] : memref<272x32xbf16, #tpu.memory_space<vmem>>, vector<32x32xbf16>
    %cst_25 = arith.constant dense<0.000000e+00> : vector<16x32xf32>
    %37 = tpu.matmul %30, %36, %cst_25 {dimension_numbers = #tpu.dot_dimension_numbers<[1], [0], [0], [1], [0, 0, 1, 1], [], []>} : vector<16x32xbf16>, vector<32x32xbf16>, vector<16x32xf32> -> vector<16x32xf32>
    %38 = arith.addf %35, %37 : vector<16x32xf32>
    %39 = vector.broadcast %31 : vector<1x32xf32> to vector<16x32xf32>
    %40 = arith.addf %38, %39 : vector<16x32xf32>
    %cst_26 = arith.constant 0.000000e+00 : f32
    %41 = vector.broadcast %cst_26 : f32 to vector<16x32xf32>
    %42 = arith.maximumf %40, %41 : vector<16x32xf32>
    %43 = arith.addf %42, %29 : vector<16x32xf32>
    %44 = arith.truncf %43 : vector<16x32xf32> to vector<16x32xbf16>
    %c3 = arith.constant 3 : index
    %c0_27 = arith.constant 0 : index
    %45 = vector.load %arg8[%c3, %c0_27] : memref<8x128xf32, #tpu.memory_space<vmem>>, vector<1x32xf32>
    %cst_28 = arith.constant dense<0.000000e+00> : vector<16x32xf32>
    %46 = tpu.matmul %1, %44, %cst_28 {dimension_numbers = #tpu.dot_dimension_numbers<[1], [0], [0], [1], [0, 0, 1, 1], [], []>} : vector<16x16xbf16>, vector<16x32xbf16>, vector<16x32xf32> -> vector<16x32xf32>
    %47 = arith.truncf %46 : vector<16x32xf32> to vector<16x32xbf16>
    %c144 = arith.constant 144 : index
    %c0_29 = arith.constant 0 : index
    %48 = vector.load %arg6[%c144, %c0_29] : memref<272x32xbf16, #tpu.memory_space<vmem>>, vector<32x32xbf16>
    %cst_30 = arith.constant dense<0.000000e+00> : vector<16x32xf32>
    %49 = tpu.matmul %47, %48, %cst_30 {dimension_numbers = #tpu.dot_dimension_numbers<[1], [0], [0], [1], [0, 0, 1, 1], [], []>} : vector<16x32xbf16>, vector<32x32xbf16>, vector<16x32xf32> -> vector<16x32xf32>
    %c176 = arith.constant 176 : index
    %c0_31 = arith.constant 0 : index
    %50 = vector.load %arg6[%c176, %c0_31] : memref<272x32xbf16, #tpu.memory_space<vmem>>, vector<32x32xbf16>
    %cst_32 = arith.constant dense<0.000000e+00> : vector<16x32xf32>
    %51 = tpu.matmul %44, %50, %cst_32 {dimension_numbers = #tpu.dot_dimension_numbers<[1], [0], [0], [1], [0, 0, 1, 1], [], []>} : vector<16x32xbf16>, vector<32x32xbf16>, vector<16x32xf32> -> vector<16x32xf32>
    %52 = arith.addf %49, %51 : vector<16x32xf32>
    %53 = vector.broadcast %45 : vector<1x32xf32> to vector<16x32xf32>
    %54 = arith.addf %52, %53 : vector<16x32xf32>
    %cst_33 = arith.constant 0.000000e+00 : f32
    %55 = vector.broadcast %cst_33 : f32 to vector<16x32xf32>
    %56 = arith.maximumf %54, %55 : vector<16x32xf32>
    %57 = arith.addf %56, %43 : vector<16x32xf32>
    %58 = arith.truncf %57 : vector<16x32xf32> to vector<16x32xbf16>
    %c0_34 = arith.constant 0 : index
    %c0_35 = arith.constant 0 : index
    %c0_36 = arith.constant 0 : index
    %59 = vector.load %arg3[%c0_34, %c0_35, %c0_36] : memref<1x2x16xbf16, #tpu.memory_space<vmem>>, vector<1x2x16xbf16>
    %60 = vector.shape_cast %59 : vector<1x2x16xbf16> to vector<2x16xbf16>
    %cst_37 = arith.constant dense<0.000000e+00> : vector<2x32xf32>
    %61 = tpu.matmul %60, %58, %cst_37 {dimension_numbers = #tpu.dot_dimension_numbers<[1], [0], [0], [1], [0, 0, 1, 1], [], []>} : vector<2x16xbf16>, vector<16x32xbf16>, vector<2x32xf32> -> vector<2x32xf32>
    %62 = arith.truncf %61 : vector<2x32xf32> to vector<2x32xbf16>
    %c0_38 = arith.constant 0 : index
    %c0_39 = arith.constant 0 : index
    %c0_40 = arith.constant 0 : index
    %63 = vector.load %arg2[%c0_38, %c0_39, %c0_40] : memref<1x2x16xbf16, #tpu.memory_space<vmem>>, vector<1x2x16xbf16>
    %64 = vector.shape_cast %63 : vector<1x2x16xbf16> to vector<2x16xbf16>
    %cst_41 = arith.constant dense<0.000000e+00> : vector<2x32xf32>
    %65 = tpu.matmul %64, %58, %cst_41 {dimension_numbers = #tpu.dot_dimension_numbers<[1], [0], [0], [1], [0, 0, 1, 1], [], []>} : vector<2x16xbf16>, vector<16x32xbf16>, vector<2x32xf32> -> vector<2x32xf32>
    %66 = arith.truncf %65 : vector<2x32xf32> to vector<2x32xbf16>
    %c208 = arith.constant 208 : index
    %c0_42 = arith.constant 0 : index
    %67 = vector.load %arg6[%c208, %c0_42] : memref<272x32xbf16, #tpu.memory_space<vmem>>, vector<32x32xbf16>
    %cst_43 = arith.constant dense<0.000000e+00> : vector<2x32xf32>
    %68 = tpu.matmul %62, %67, %cst_43 {dimension_numbers = #tpu.dot_dimension_numbers<[1], [0], [0], [1], [0, 0, 1, 1], [], []>} : vector<2x32xbf16>, vector<32x32xbf16>, vector<2x32xf32> -> vector<2x32xf32>
    %c240 = arith.constant 240 : index
    %c0_44 = arith.constant 0 : index
    %69 = vector.load %arg6[%c240, %c0_44] : memref<272x32xbf16, #tpu.memory_space<vmem>>, vector<32x32xbf16>
    %cst_45 = arith.constant dense<0.000000e+00> : vector<2x32xf32>
    %70 = tpu.matmul %66, %69, %cst_45 {dimension_numbers = #tpu.dot_dimension_numbers<[1], [0], [0], [1], [0, 0, 1, 1], [], []>} : vector<2x32xbf16>, vector<32x32xbf16>, vector<2x32xf32> -> vector<2x32xf32>
    %71 = arith.addf %68, %70 : vector<2x32xf32>
    %c0_46 = arith.constant 0 : index
    %c0_47 = arith.constant 0 : index
    %c0_48 = arith.constant 0 : index
    %72 = vector.load %arg5[%c0_46, %c0_47, %c0_48] : memref<1x2x32xf32, #tpu.memory_space<vmem>>, vector<1x2x32xf32>
    %73 = vector.shape_cast %72 : vector<1x2x32xf32> to vector<2x32xf32>
    %74 = arith.addf %71, %73 : vector<2x32xf32>
    %75 = arith.truncf %74 : vector<2x32xf32> to vector<2x32xbf16>
    %c0_49 = arith.constant 0 : index
    %c0_50 = arith.constant 0 : index
    %76 = vector.load %arg7[%c0_49, %c0_50] : memref<192x128xbf16, #tpu.memory_space<vmem>>, vector<32x128xbf16>
    %cst_51 = arith.constant dense<0.000000e+00> : vector<2x128xf32>
    %77 = tpu.matmul %75, %76, %cst_51 {dimension_numbers = #tpu.dot_dimension_numbers<[1], [0], [0], [1], [0, 0, 1, 1], [], []>} : vector<2x32xbf16>, vector<32x128xbf16>, vector<2x128xf32> -> vector<2x128xf32>
    %c4 = arith.constant 4 : index
    %c0_52 = arith.constant 0 : index
    %78 = vector.load %arg8[%c4, %c0_52] : memref<8x128xf32, #tpu.memory_space<vmem>>, vector<1x128xf32>
    %79 = vector.broadcast %78 : vector<1x128xf32> to vector<2x128xf32>
    %80 = arith.addf %77, %79 : vector<2x128xf32>
    %cst_53 = arith.constant 0.000000e+00 : f32
    %81 = vector.broadcast %cst_53 : f32 to vector<2x128xf32>
    %82 = arith.cmpf ogt, %80, %81 : vector<2x128xf32>
    %cst_54 = arith.constant 0.00999999977 : f32
    %83 = vector.broadcast %cst_54 : f32 to vector<2x128xf32>
    %84 = arith.mulf %83, %80 : vector<2x128xf32>
    %85 = arith.select %82, %80, %84 : vector<2x128xi1>, vector<2x128xf32>
    %86 = arith.truncf %85 : vector<2x128xf32> to vector<2x128xbf16>
    %c32 = arith.constant 32 : index
    %c0_55 = arith.constant 0 : index
    %87 = vector.load %arg7[%c32, %c0_55] : memref<192x128xbf16, #tpu.memory_space<vmem>>, vector<128x32xbf16>
    %cst_56 = arith.constant dense<0.000000e+00> : vector<2x32xf32>
    %88 = tpu.matmul %86, %87, %cst_56 {dimension_numbers = #tpu.dot_dimension_numbers<[1], [0], [0], [1], [0, 0, 1, 1], [], []>} : vector<2x128xbf16>, vector<128x32xbf16>, vector<2x32xf32> -> vector<2x32xf32>
    %c5 = arith.constant 5 : index
    %c0_57 = arith.constant 0 : index
    %89 = vector.load %arg8[%c5, %c0_57] : memref<8x128xf32, #tpu.memory_space<vmem>>, vector<1x32xf32>
    %90 = vector.broadcast %89 : vector<1x32xf32> to vector<2x32xf32>
    %91 = arith.addf %88, %90 : vector<2x32xf32>
    %cst_58 = arith.constant 0.000000e+00 : f32
    %92 = vector.broadcast %cst_58 : f32 to vector<2x32xf32>
    %93 = arith.cmpf ogt, %91, %92 : vector<2x32xf32>
    %cst_59 = arith.constant 0.00999999977 : f32
    %94 = vector.broadcast %cst_59 : f32 to vector<2x32xf32>
    %95 = arith.mulf %94, %91 : vector<2x32xf32>
    %96 = arith.select %93, %91, %95 : vector<2x32xi1>, vector<2x32xf32>
    %97 = arith.truncf %96 : vector<2x32xf32> to vector<2x32xbf16>
    %c160 = arith.constant 160 : index
    %c0_60 = arith.constant 0 : index
    %98 = vector.load %arg7[%c160, %c0_60] : memref<192x128xbf16, #tpu.memory_space<vmem>>, vector<32x1xbf16>
    %cst_61 = arith.constant dense<0.000000e+00> : vector<2x1xf32>
    %99 = tpu.matmul %97, %98, %cst_61 {dimension_numbers = #tpu.dot_dimension_numbers<[1], [0], [0], [1], [0, 0, 1, 1], [], []>} : vector<2x32xbf16>, vector<32x1xbf16>, vector<2x1xf32> -> vector<2x1xf32>
    %c6 = arith.constant 6 : index
    %c0_62 = arith.constant 0 : index
    %100 = vector.load %arg8[%c6, %c0_62] : memref<8x128xf32, #tpu.memory_space<vmem>>, vector<1x1xf32>
    %101 = vector.broadcast %100 : vector<1x1xf32> to vector<2x1xf32>
    %102 = arith.addf %99, %101 : vector<2x1xf32>
    %c0_63 = arith.constant 0 : index
    %c0_64 = arith.constant 0 : index
    %c0_65 = arith.constant 0 : index
    %103 = vector.load %arg9[%c0_63, %c0_64, %c0_65] : memref<1x2x1xf32, #tpu.memory_space<vmem>>, vector<1x2x1xf32>
    %104 = vector.shape_cast %103 : vector<1x2x1xf32> to vector<2x1xf32>
    %105 = vector.shape_cast %102 : vector<2x1xf32> to vector<1x2x1xf32>
    tpu.vector_store %arg9[%c0_63, %c0_64, %c0_65], %105 {strides = array<i32>} : memref<1x2x1xf32, #tpu.memory_space<vmem>>, vector<1x2x1xf32>,
    return
  }
  func.func @transform_0(%arg0: i32) -> (i32, i32, i32) {
    %c0_i32 = arith.constant 0 : i32
    %c0_i32_0 = arith.constant 0 : i32
    %c0_i32_1 = arith.constant 0 : i32
    return %arg0, %c0_i32, %c0_i32_0 : i32, i32, i32
  }
  func.func @transform_1(%arg0: i32) -> (i32, i32, i32) {
    %c0_i32 = arith.constant 0 : i32
    %c0_i32_0 = arith.constant 0 : i32
    %c0_i32_1 = arith.constant 0 : i32
    return %arg0, %c0_i32, %c0_i32_0 : i32, i32, i32
  }
  func.func @transform_2(%arg0: i32) -> (i32, i32, i32) {
    %c0_i32 = arith.constant 0 : i32
    %c0_i32_0 = arith.constant 0 : i32
    %c0_i32_1 = arith.constant 0 : i32
    return %arg0, %c0_i32, %c0_i32_0 : i32, i32, i32
  }
  func.func @transform_3(%arg0: i32) -> (i32, i32, i32) {
    %c0_i32 = arith.constant 0 : i32
    %c0_i32_0 = arith.constant 0 : i32
    %c0_i32_1 = arith.constant 0 : i32
    return %arg0, %c0_i32, %c0_i32_0 : i32, i32, i32
  }
  func.func @transform_4(%arg0: i32) -> (i32, i32, i32) {
    %c0_i32 = arith.constant 0 : i32
    %c0_i32_0 = arith.constant 0 : i32
    %c0_i32_1 = arith.constant 0 : i32
    return %arg0, %c0_i32, %c0_i32_0 : i32, i32, i32
  }
  func.func @transform_5(%arg0: i32) -> (i32, i32) {
    %c0_i32 = arith.constant 0 : i32
    %c0_i32_0 = arith.constant 0 : i32
    %c0_i32_1 = arith.constant 0 : i32
    return %c0_i32, %c0_i32_0 : i32, i32
  }
  func.func @transform_6(%arg0: i32) -> (i32, i32) {
    %c0_i32 = arith.constant 0 : i32
    %c0_i32_0 = arith.constant 0 : i32
    %c0_i32_1 = arith.constant 0 : i32
    return %c0_i32, %c0_i32_0 : i32, i32
  }
  func.func @transform_7(%arg0: i32) -> (i32, i32) {
    %c0_i32 = arith.constant 0 : i32
    %c0_i32_0 = arith.constant 0 : i32
    %c0_i32_1 = arith.constant 0 : i32
    return %c0_i32, %c0_i32_0 : i32, i32
  }
  func.func @transform_8(%arg0: i32) -> (i32, i32, i32) {
    %c0_i32 = arith.constant 0 : i32
    %c0_i32_0 = arith.constant 0 : i32
    %c0_i32_1 = arith.constant 0 : i32
    return %arg0, %c0_i32, %c0_i32_0 : i32, i32, i32
  }
}

</mosaic_0001>

<bundles_post_ra>
// kernel: tpu_custom_call.1
= control target key start
LH: loop header
LB: loop body
LE: loop exit
PB: predicated region body
PF: predicated region fallthrough
CT: control target
= control target key end

     0   :  { %s1983_s27 = smov 0   ;;  %s2233_s0 = inlined_call_operand.vmem [shape: bf16[2,16,16], index: 0, kind: input, shape index: {}]   ;;  %s2234_s1 = inlined_call_operand.vmem [shape: bf16[2,2,16], index: 1, kind: input, shape index: {}]   ;;  %s2235_s2 = inlined_call_operand.vmem [shape: bf16[2,2,16], index: 2, kind: input, shape index: {}]   ;;  %s2236_s3 = inlined_call_operand.vmem [shape: bf16[2,16,8], index: 3, kind: input, shape index: {}]   ;;  %s2237_s4 = inlined_call_operand.vmem [shape: f32[2,2,32], index: 4, kind: input, shape index: {}]   ;;  %s2238_s5 = inlined_call_operand.vmem [shape: bf16[272,32], index: 5, kind: input, shape index: {}]   ;;  %s2239_s6 = inlined_call_operand.vmem [shape: bf16[192,128], index: 6, kind: input, shape index: {}]   ;;  %s2240_s7 = inlined_call_operand.vmem [shape: f32[8,128], index: 7, kind: input, shape index: {}]   ;;  %s2241_s8 = inlined_call_operand.vmem [shape: f32[2,2,1], index: 8, kind: output, shape index: {}]  }
   0x1 LB: > { %s1615_s28 = sadd.s32 4294967295, %s1934_s27   ;;  %p1619_p0 = scmp.ge.s32.totalorder %s1934_s27, 1  ;;  %s1934_s27 = sphi %s1983_s27, %s18_s27  }
   0x2   : > { %p297_p1 = scmp.lt.s32.totalorder %s1934_s27, 3 }
   0x4   : > { %p298_p2 = pnand %p1619_p0, %p297_p1 }
   0x5   : > { %p345_p3 = scmp.lt.s32.totalorder (!%p298_p2), %s1615_s28, 1 }
   0x6   : > { %301 = sbr.rel (%p298_p2) target bundleno = 2645 (0xa55), region = 52 }
   0xb   : > { %v1936_v0 = vmov 0.0   ;;  %vm1937_vm0 = vmmov 0   ;;  %s2243_s28 = smov (!%p345_p3, %s1615_s28), 1  ;;  %v433_v1 = vld [vmem:[%s2238_s5 + $0x4] sm:$0xf]  ;;  %vm438_vm1 = vcmask 1043456  }
   0xc   : > { %1740 = vmatprep.subr.bf16.mxu0 %v1936_v0  ;;  %1742 = vmatprep.mubr.msk.bf16.mxu0 %vm1937_vm0, %v1936_v0  ;;  %s1683_s9 = sshll.u32 %s2243_s28, 3  ;;  %vm386_vm2 = vcmask 130048   ;;  %v440_v4 = vsel %vm438_vm1, %v433_v1, 0  ;;  %vm434_vm3 = vcmask 64512   ;;  %v432_v5 = vld [vmem:[%s2238_s5] sm:$0xf] }
   0xd   : > { %1758 = vmatprep.subr.bf16.mxu1 %v1936_v0  ;;  %1760 = vmatprep.mubr.msk.bf16.mxu1 %vm1937_vm0, %v1936_v0  ;;  %s349_s12 = scalar_lea.vmem %s2233_s0, %s1683_s9  ;;  %s360_s15 = scalar_lea.vmem %s2236_s3, %s1683_s9  ;;  %v487_v6 = vsel %vm438_vm1, %v432_v5, 0  ;;  %v1900_v16 = vld [vmem:[%s2238_s5 + $0x20] sm:$0xff]   ;;  %v1901_v17 = vld [vmem:[%s2238_s5 + $0x18] sm:$0xff]   ;;  %vm602_vm4 = vcmask 261120   ;;  %v1902_v30 = vld [vmem:[%s2238_s5 + $0x10] sm:$0xff]   ;;  %vm1518_vm7 = vcmask 1024  }
   0xe   : > { %v1898_v2 = vld [vmem:[%s360_s15] sm:$0xff]   ;;  %v1903_v31 = vld [vmem:[%s2238_s5 + $0x8] sm:$0xff]   ;;  %v1905_v42 = vld [vmem:[%s2238_s5 + $0x38] sm:$0xff]   ;;  %s352_s15 = scalar_lea.vmem %s2234_s1, %s2243_s28  ;;  %s1624_s20 = sshll.u32 %s2243_s28, 1 }
   0xf   : > { %v2009_v3 = vld [vmem:[%s349_s12] sm:$0xff]   ;;  %1741 = vmatpush3.bf16.msra.mxu0 %v1898_v2  ;;  %v1906_v57 = vld [vmem:[%s2238_s5 + $0x30] sm:$0xff]   ;;  %v1907_v58 = vld [vmem:[%s2238_s5 + $0x28] sm:$0xff]   ;;  %s355_s12 = scalar_lea.vmem %s2235_s2, %s2243_s28  ;;  %s364_s23 = scalar_lea.vmem %s2237_s4, %s1624_s20 }
  0x10   : > { %1746 = vmatprep.subr.bf16.mxu0 %v1936_v0  ;;  %v1631_v20 = vld [vmem:[%s2240_s7] ss:$0 sm:$0xff]  ;;  %v1639_v43 = vld [vmem:[%s2240_s7 + $0x1] ss:$0 sm:$0xff]  ;;  %s368_s21 = scalar_lea.vmem %s2241_s8, %s1624_s20 }
  0x11   : > { %v1904_v41 = vld [vmem:[%s2238_s5 + $0x40] sm:$0xff]  }
  0x12   : > { %1743 = vmatmul.mubr.msk.bf16.vlgmr.msra.gmra.mxu0 %vm386_vm2, %v2009_v3 }
  0x13   : > { %1747 = vmatpush3.bf16.msra.mxu0 %v440_v4  ;;  %1748 = vmatprep.mubr.msk.bf16.mxu0 %vm1937_vm0, %v1936_v0 }
  0x14   : > { %1752 = vmatprep.subr.bf16.mxu0 %v1936_v0 }
  0x1a   : > { %1749 = vmatmul.mubr.msk.bf16.vlgmr.msra.gmra.mxu0 %vm434_vm3, %v1898_v2 }
  0x1b   : > { %1754 = vmatprep.mubr.msk.bf16.mxu0 %vm1937_vm0, %v1936_v0  ;;  %1753 = vmatpush3.bf16.msra.mxu0 %v487_v6  ;;  %v1908_v6 = vld [vmem:[%s2238_s5 + $0x60] sm:$0xff]  }
  0x1c   : > { %1764 = vmatprep.subr.bf16.mxu0 %v1936_v0 }
  0xd2   : > { %v424_v7 = vpop.f32.mrf.mxu0 }
  0xd4   : > { %v1744_v8 = vpop.f32.mrf.mxu0 }
  0xd5   : > { %v1647_v8 = vld [vmem:[%s2240_s7 + $0x2] ss:$0 sm:$0xff] }
  0xd6   : > { %v427_v9 = vpop.f32.mrf.mxu0 }
  0xd7   : > { %v431_v10 = vpack.c.bf16 %v427_v9, %v424_v7  ;;  %v1909_v7 = vld [vmem:[%s2238_s5 + $0x58] sm:$0xff]  }
  0xd8   : > { %v1745_v11 = vpop.f32.mrf.mxu0 }
  0xd9   : > { %1755 = vmatmul.mubr.msk.bf16.vlgmr.msra.gmra.mxu0 %vm434_vm3, %v431_v10 }
  0xda   : > { %v476_v12 = vpop.f32.mrf.mxu0  ;;  %1768 = vmatprep.mubr.msk.bf16.mxu0 %vm1937_vm0, %v1936_v0  ;;  %1765 = vmatpush3.bf16.msra.mxu0 %v1900_v16 }
  0xdb   : > { %1766 = vmatprep.subr.bf16.mxu0 %v1936_v0 }
  0xdc   : > { %v1750_v13 = vpop.f32.mrf.mxu0 }
  0xde   : > { %v479_v14 = vpop.f32.mrf.mxu0  ;;  %1767 = vmatpush3.bf16.msra.mxu0 %v1901_v17 }
  0xdf   : > { %1780 = vmatprep.subr.bf16.mxu0 %v1936_v0 }
  0xe0   : > { %v1751_v15 = vpop.f32.mrf.mxu0 }
 0x199   : > { %v523_v18 = vpop.f32.mrf.mxu0 }
 0x19a   : > { %v524_v19 = vadd.f32 %v523_v18, %v476_v12 }
 0x19b   : > { %v1756_v21 = vpop.f32.mrf.mxu0 }
 0x19c   : > { %v534_v23 = vadd.f32 %v1631_v20, %v524_v19 }
 0x19d   : > { %v526_v22 = vpop.f32.mrf.mxu0 }
 0x19e   : > { %v527_v24 = vadd.f32 %v526_v22, %v479_v14  ;;  %v536_v27 = vmax.f32 %v534_v23, 0.0  ;;  %v1910_v22 = vld [vmem:[%s2238_s5 + $0x50] sm:$0xff]   ;;  %v1911_v23 = vld [vmem:[%s2238_s5 + $0x48] sm:$0xff]  }
 0x19f   : > { %v1757_v25 = vpop.f32.mrf.mxu0 }
 0x1a0   : > { %v535_v26 = vadd.f32 %v1631_v20, %v527_v24 }
 0x1a2   : > { %v537_v28 = vmax.f32 %v535_v26, 0.0 }
 0x1a4   : > { %v538_v29 = vpack.c.bf16 %v537_v28, %v536_v27 }
 0x1a6   : > { %1759 = vmatpush3.bf16.msra.mxu1 %v538_v29  ;;  %1769 = vmatmul.mubr.msk.bf16.vlgmr.msra.gmra.mxu0 %vm602_vm4, %v538_v29 }
 0x1a7   : > { %1772 = vmatprep.subr.bf16.mxu1 %v1936_v0  ;;  %1782 = vmatprep.mubr.msk.bf16.mxu0 %vm1937_vm0, %v1936_v0 }
 0x1a9   : > { %1761 = vmatmul.mubr.msk.bf16.vlgmr.msra.gmra.mxu1 %vm386_vm2, %v2009_v3 }
 0x1aa   : > { %1776 = vmatprep.mubr.msk.bf16.mxu1 %vm1937_vm0, %v1936_v0  ;;  %1773 = vmatpush3.bf16.msra.mxu1 %v1902_v30 }
 0x1ab   : > { %1774 = vmatprep.subr.bf16.mxu1 %v1936_v0 }
 0x1ae   : > { %1775 = vmatpush3.bf16.msra.mxu1 %v1903_v31 }
 0x1af   : > { %1786 = vmatprep.subr.bf16.mxu1 %v1936_v0 }
 0x266   : > { %v640_v32 = vpop.f32.mrf.mxu0 }
 0x268   : > { %v1770_v33 = vpop.f32.mrf.mxu0 }
 0x269   : > { %v574_v34 = vpop.f32.mrf.mxu1 }
 0x26a   : > { %v643_v35 = vpop.f32.mrf.mxu0 }
 0x26b   : > { %v1762_v36 = vpop.f32.mrf.mxu1 }
 0x26c   : > { %v1771_v37 = vpop.f32.mrf.mxu0 }
 0x26d   : > { %v577_v38 = vpop.f32.mrf.mxu1 }
 0x26e   : > { %v581_v39 = vpack.c.bf16 %v577_v38, %v574_v34 }
 0x26f   : > { %v1763_v40 = vpop.f32.mrf.mxu1 }
 0x270   : > { %1777 = vmatmul.mubr.msk.bf16.vlgmr.msra.gmra.mxu1 %vm602_vm4, %v581_v39 }
 0x271   : > { %1790 = vmatprep.mubr.msk.bf16.mxu1 %vm1937_vm0, %v1936_v0  ;;  %1787 = vmatpush3.bf16.msra.mxu1 %v1904_v41 }
 0x272   : > { %1788 = vmatprep.subr.bf16.mxu1 %v1936_v0 }
 0x275   : > { %1789 = vmatpush3.bf16.msra.mxu1 %v1905_v42 }
 0x276   : > { %1802 = vmatprep.subr.bf16.mxu1 %v1936_v0 }
 0x330   : > { %v696_v44 = vpop.f32.mrf.mxu1 }
 0x331   : > { %v697_v45 = vadd.f32 %v696_v44, %v640_v32  ;;  %v1655_v32 = vld [vmem:[%s2240_s7 + $0x3] ss:$0 sm:$0xff] }
 0x332   : > { %v1778_v46 = vpop.f32.mrf.mxu1 }
 0x333   : > { %v707_v47 = vadd.f32 %v1639_v43, %v697_v45  ;;  %v1062_v46 = vld [vmem:[%s355_s12] sm:$0x1] }
 0x334   : > { %v699_v48 = vpop.f32.mrf.mxu1 }
 0x335   : > { %v700_v49 = vadd.f32 %v699_v48, %v643_v35  ;;  %v709_v51 = vmax.f32 %v707_v47, 0.0  ;;  %v1107_v47 = vld [vmem:[%s352_s15] sm:$0x1] }
 0x336   : > { %v1779_v50 = vpop.f32.mrf.mxu1  ;;  %v1912_v48 = vld [vmem:[%s2238_s5 + $0x80] sm:$0xff]  }
 0x337   : > { %v708_v52 = vadd.f32 %v1639_v43, %v700_v49  ;;  %v711_v54 = vadd.f32 %v709_v51, %v536_v27  ;;  %v1913_v49 = vld [vmem:[%s2238_s5 + $0x70] sm:$0xff]   ;;  %v1914_v50 = vld [vmem:[%s2238_s5 + $0x78] sm:$0xff]   ;;  %v1915_v51 = vld [vmem:[%s2238_s5 + $0x68] sm:$0xff]  }
 0x339   : > { %v710_v53 = vmax.f32 %v708_v52, 0.0 }
 0x33b   : > { %v712_v55 = vadd.f32 %v710_v53, %v537_v28 }
 0x33d   : > { %v713_v56 = vpack.c.bf16 %v712_v55, %v711_v54 }
 0x33f   : > { %1781 = vmatpush3.bf16.msra.mxu0 %v713_v56  ;;  %1791 = vmatmul.mubr.msk.bf16.vlgmr.msra.gmra.mxu1 %vm602_vm4, %v713_v56 }
 0x340   : > { %1794 = vmatprep.subr.bf16.mxu0 %v1936_v0  ;;  %1804 = vmatprep.mubr.msk.bf16.mxu1 %vm1937_vm0, %v1936_v0 }
 0x342   : > { %1783 = vmatmul.mubr.msk.bf16.vlgmr.msra.gmra.mxu0 %vm386_vm2, %v2009_v3 }
 0x343   : > { %1798 = vmatprep.mubr.msk.bf16.mxu0 %vm1937_vm0, %v1936_v0  ;;  %1795 = vmatpush3.bf16.msra.mxu0 %v1906_v57 }
 0x344   : > { %1796 = vmatprep.subr.bf16.mxu0 %v1936_v0 }
 0x347   : > { %1797 = vmatpush3.bf16.msra.mxu0 %v1907_v58 }
 0x348   : > { %1808 = vmatprep.subr.bf16.mxu0 %v1936_v0 }
 0x3ff   : > { %v814_v59 = vpop.f32.mrf.mxu1 }
 0x401   : > { %v1792_v60 = vpop.f32.mrf.mxu1 }
 0x402   : > { %v749_v61 = vpop.f32.mrf.mxu0 }
 0x403   : > { %v817_v62 = vpop.f32.mrf.mxu1 }
 0x404   : > { %v1784_v63 = vpop.f32.mrf.mxu0 }
 0x405   : > { %v1793_v1 = vpop.f32.mrf.mxu1  ;;  %v1917_v63 = vld [vmem:[%s2239_s6] sm:$0xff]  }
 0x406   : > { %v752_v2 = vpop.f32.mrf.mxu0  ;;  %v1918_v1 = vld [vmem:[%s2239_s6 + $0x48] sm:$0xff]  }
 0x407   : > { %v756_v4 = vpack.c.bf16 %v752_v2, %v749_v61  ;;  %v1919_v2 = vld [vmem:[%s2239_s6 + $0x40] sm:$0xff]  }
 0x408   : > { %v1785_v5 = vpop.f32.mrf.mxu0 }
 0x409   : > { %1799 = vmatmul.mubr.msk.bf16.vlgmr.msra.gmra.mxu0 %vm602_vm4, %v756_v4  ;;  %v1920_v4 = vld [vmem:[%s2239_s6 + $0x38] sm:$0xff]   ;;  %v1921_v5 = vld [vmem:[%s2239_s6 + $0x30] sm:$0xff]  }
 0x40a   : > { %1812 = vmatprep.mubr.msk.bf16.mxu0 %vm1937_vm0, %v1936_v0  ;;  %1809 = vmatpush3.bf16.msra.mxu0 %v1908_v6  ;;  %v1922_v6 = vld [vmem:[%s2239_s6 + $0x28] sm:$0xff]  }
 0x40b   : > { %1810 = vmatprep.subr.bf16.mxu0 %v1936_v0 }
 0x40e   : > { %1811 = vmatpush3.bf16.msra.mxu0 %v1909_v7  ;;  %v1923_v7 = vld [vmem:[%s2239_s6 + $0x20] sm:$0xff]  }
 0x40f   : > { %1824 = vmatprep.subr.bf16.mxu0 %v1936_v0 }
 0x4c9   : > { %v870_v9 = vpop.f32.mrf.mxu0 }
 0x4ca   : > { %v871_v10 = vadd.f32 %v870_v9, %v814_v59 }
 0x4cb   : > { %v1800_v11 = vpop.f32.mrf.mxu0 }
 0x4cc   : > { %v881_v12 = vadd.f32 %v1647_v8, %v871_v10  ;;  %v1270_v10 = vld [vmem:[%s364_s23] sm:$0x3] }
 0x4cd   : > { %v873_v13 = vpop.f32.mrf.mxu0 }
 0x4ce   : > { %v874_v14 = vadd.f32 %v873_v13, %v817_v62  ;;  %v883_v16 = vmax.f32 %v881_v12, 0.0  ;;  %v1916_v62 = vld [vmem:[%s2239_s6 + $0x8] sm:$0xff]  }
 0x4cf   : > { %v1801_v15 = vpop.f32.mrf.mxu0 }
 0x4d0   : > { %v882_v17 = vadd.f32 %v1647_v8, %v874_v14  ;;  %v885_v19 = vadd.f32 %v883_v16, %v711_v54 }
 0x4d2   : > { %v884_v18 = vmax.f32 %v882_v17, 0.0 }
 0x4d4   : > { %v886_v20 = vadd.f32 %v884_v18, %v712_v55 }
 0x4d6   : > { %v887_v21 = vpack.c.bf16 %v886_v20, %v885_v19 }
 0x4d8   : > { %1803 = vmatpush3.bf16.msra.mxu1 %v887_v21  ;;  %1813 = vmatmul.mubr.msk.bf16.vlgmr.msra.gmra.mxu0 %vm602_vm4, %v887_v21  ;;  %v1925_v21 = vld [vmem:[%s2239_s6 + $0x10] sm:$0xff]  }
 0x4d9   : > { %1816 = vmatprep.subr.bf16.mxu1 %v1936_v0  ;;  %1826 = vmatprep.mubr.msk.bf16.mxu0 %vm1937_vm0, %v1936_v0 }
 0x4db   : > { %1805 = vmatmul.mubr.msk.bf16.vlgmr.msra.gmra.mxu1 %vm386_vm2, %v2009_v3 }
 0x4dc   : > { %1820 = vmatprep.mubr.msk.bf16.mxu1 %vm1937_vm0, %v1936_v0  ;;  %1817 = vmatpush3.bf16.msra.mxu1 %v1910_v22  ;;  %v1664_v22 = vld [vmem:[%s2240_s7 + $0x4] ss:$0 sm:$0xff] }
 0x4dd   : > { %1818 = vmatprep.subr.bf16.mxu1 %v1936_v0 }
 0x4e0   : > { %1819 = vmatpush3.bf16.msra.mxu1 %v1911_v23 }
 0x4e1   : > { %1830 = vmatprep.subr.bf16.mxu1 %v1936_v0 }
 0x598   : > { %v988_v24 = vpop.f32.mrf.mxu0 }
 0x59a   : > { %v1814_v25 = vpop.f32.mrf.mxu0 }
 0x59b   : > { %v923_v3 = vpop.f32.mrf.mxu1 }
 0x59c   : > { %v991_v26 = vpop.f32.mrf.mxu0 }
 0x59d   : > { %v1806_v27 = vpop.f32.mrf.mxu1 }
 0x59e   : > { %v1815_v28 = vpop.f32.mrf.mxu0 }
 0x59f   : > { %v926_v29 = vpop.f32.mrf.mxu1 }
 0x5a0   : > { %v930_v30 = vpack.c.bf16 %v926_v29, %v923_v3 }
 0x5a1   : > { %v1807_v31 = vpop.f32.mrf.mxu1 }
 0x5a2   : > { %1821 = vmatmul.mubr.msk.bf16.vlgmr.msra.gmra.mxu1 %vm602_vm4, %v930_v30  ;;  %v1926_v30 = vld [vmem:[%s2239_s6 + $0x58] sm:$0xff]   ;;  %v1927_v31 = vld [vmem:[%s2239_s6 + $0x50] sm:$0xff]  }
 0x5a3   : > { %1832 = vmatprep.mubr.msk.bf16.mxu1 %vm1937_vm0, %v1936_v0 }
 0x662   : > { %v1044_v33 = vpop.f32.mrf.mxu1 }
 0x663   : > { %v1045_v34 = vadd.f32 %v1044_v33, %v988_v24 }
 0x664   : > { %v1822_v35 = vpop.f32.mrf.mxu1 }
 0x665   : > { %v1055_v36 = vadd.f32 %v1655_v32, %v1045_v34 }
 0x666   : > { %v1047_v37 = vpop.f32.mrf.mxu1 }
 0x667   : > { %v1048_v38 = vadd.f32 %v1047_v37, %v991_v26  ;;  %v1057_v40 = vmax.f32 %v1055_v36, 0.0 }
 0x668   : > { %v1823_v39 = vpop.f32.mrf.mxu1 }
 0x669   : > { %v1056_v41 = vadd.f32 %v1655_v32, %v1048_v38  ;;  %v1059_v43 = vadd.f32 %v1057_v40, %v885_v19  ;;  %v1668_v32 = vld [vmem:[%s2240_s7 + $0x5] ss:$0 sm:$0xff] }
 0x66b   : > { %v1058_v42 = vmax.f32 %v1056_v41, 0.0 }
 0x66d   : > { %v1060_v44 = vadd.f32 %v1058_v42, %v886_v20  ;;  %v1924_v20 = vld [vmem:[%s2239_s6 + $0x18] sm:$0xff]  }
 0x66f   : > { %v1061_v45 = vpack.c.bf16 %v1060_v44, %v1059_v43 }
 0x671   : > { %1825 = vmatpush3.bf16.msra.mxu0 %v1061_v45  ;;  %1831 = vmatpush3.bf16.msra.mxu1 %v1061_v45 }
 0x672   : > { %1836 = vmatprep.subr.bf16.mxu0 %v1936_v0  ;;  %1844 = vmatprep.subr.bf16.mxu1 %v1936_v0 }
 0x674   : > { %1827 = vmatmul.mubr.msk.bf16.vlgmr.msra.gmra.mxu0 %vm386_vm2, %v1062_v46  ;;  %1833 = vmatmul.mubr.msk.bf16.vlgmr.msra.gmra.mxu1 %vm386_vm2, %v1107_v47 }
 0x675   : > { %1837 = vmatpush3.bf16.msra.mxu0 %v1912_v48  ;;  %1845 = vmatpush3.bf16.msra.mxu1 %v1913_v49 }
 0x676   : > { %1838 = vmatprep.subr.bf16.mxu0 %v1936_v0  ;;  %1846 = vmatprep.subr.bf16.mxu1 %v1936_v0 }
 0x677   : > { %1840 = vmatprep.mubr.msk.bf16.mxu0 %vm1937_vm0, %v1936_v0  ;;  %1848 = vmatprep.mubr.msk.bf16.mxu1 %vm1937_vm0, %v1936_v0 }
 0x679   : > { %1839 = vmatpush3.bf16.msra.mxu0 %v1914_v50  ;;  %1847 = vmatpush3.bf16.msra.mxu1 %v1915_v51 }
 0x67a   : > { %1852 = vmatprep.subr.bf16.mxu0 %v1936_v0  ;;  %1860 = vmatprep.subr.bf16.mxu1 %v1936_v0 }
 0x734   : > { %v1100_v52 = vpop.f32.mrf.mxu0  ;;  %v1145_v53 = vpop.f32.mrf.mxu1 }
 0x735   : > { %v1106_v54 = vpack.c.bf16 %v1100_v52, %v1100_v52  ;;  %v1151_v55 = vpack.c.bf16 %v1145_v53, %v1145_v53 }
 0x736   : > { %v1828_v56 = vpop.f32.mrf.mxu0  ;;  %v1834_v57 = vpop.f32.mrf.mxu1 }
 0x737   : > { %1841 = vmatmul.mubr.msk.bf16.vlgmr.msra.gmra.mxu0 %vm602_vm4, %v1151_v55  ;;  %1849 = vmatmul.mubr.msk.bf16.vlgmr.msra.gmra.mxu1 %vm602_vm4, %v1106_v54 }
 0x738   : > { %v1103_v58 = vpop.f32.mrf.mxu0  ;;  %v1148_v59 = vpop.f32.mrf.mxu1  ;;  %1856 = vmatprep.mubr.msk.bf16.mxu0 %vm1937_vm0, %v1936_v0  ;;  %1876 = vmatprep.mubr.msk.bf16.mxu1 %vm1937_vm0, %v1936_v0 }
 0x739   : > { %1853 = vmatpush3.bf16.msra.mxu0 %v1916_v62  ;;  %1861 = vmatpush3.bf16.msra.mxu1 %v1918_v1 }
 0x73a   : > { %v1829_v60 = vpop.f32.mrf.mxu0  ;;  %v1835_v61 = vpop.f32.mrf.mxu1  ;;  %1854 = vmatprep.subr.bf16.mxu0 %v1936_v0  ;;  %1862 = vmatprep.subr.bf16.mxu1 %v1936_v0 }
 0x73d   : > { %1855 = vmatpush3.bf16.msra.mxu0 %v1917_v63  ;;  %1863 = vmatpush3.bf16.msra.mxu1 %v1919_v2 }
 0x73e   : > { %1880 = vmatprep.subr.bf16.mxu0 %v1936_v0  ;;  %1864 = vmatprep.subr.bf16.mxu1 %v1936_v0 }
 0x741   : > { %1865 = vmatpush3.bf16.msra.mxu1 %v1920_v4 }
 0x742   : > { %1866 = vmatprep.subr.bf16.mxu1 %v1936_v0 }
 0x745   : > { %1867 = vmatpush3.bf16.msra.mxu1 %v1921_v5 }
 0x746   : > { %1868 = vmatprep.subr.bf16.mxu1 %v1936_v0 }
 0x749   : > { %1869 = vmatpush3.bf16.msra.mxu1 %v1922_v6 }
 0x74a   : > { %1870 = vmatprep.subr.bf16.mxu1 %v1936_v0 }
 0x74d   : > { %1871 = vmatpush3.bf16.msra.mxu1 %v1923_v7 }
 0x74e   : > { %1872 = vmatprep.subr.bf16.mxu1 %v1936_v0 }
 0x751   : > { %1873 = vmatpush3.bf16.msra.mxu1 %v1924_v20 }
 0x752   : > { %1874 = vmatprep.subr.bf16.mxu1 %v1936_v0 }
 0x755   : > { %1875 = vmatpush3.bf16.msra.mxu1 %v1925_v21 }
 0x7f7   : > { %v1209_v8 = vpop.f32.mrf.mxu0  ;;  %v1264_v9 = vpop.f32.mrf.mxu1 }
 0x7f8   : > { %v1265_v11 = vadd.f32 %v1264_v9, %v1209_v8 }
 0x7f9   : > { %v1842_v12 = vpop.f32.mrf.mxu0  ;;  %v1850_v13 = vpop.f32.mrf.mxu1 }
 0x7fa   : > { %v1271_v14 = vadd.f32 %v1270_v10, %v1265_v11 }
 0x7fb   : > { %v1212_v15 = vpop.f32.mrf.mxu0  ;;  %v1267_v16 = vpop.f32.mrf.mxu1 }
 0x7fc   : > { %v1272_v17 = vpack.c.bf16 %v1271_v14, %v1271_v14 }
 0x7fd   : > { %v1843_v18 = vpop.f32.mrf.mxu0  ;;  %v1851_v19 = vpop.f32.mrf.mxu1 }
 0x7fe   : > { %1857 = vmatmul.mubr.msk.bf16.vlgmr.msra.gmra.mxu0 %vm602_vm4, %v1272_v17 }
 0x7ff   : > { %1884 = vmatprep.mubr.msk.bf16.mxu0 %vm1937_vm0, %v1936_v0  ;;  %1881 = vmatpush3.bf16.msra.mxu0 %v1926_v30 }
 0x800   : > { %1882 = vmatprep.subr.bf16.mxu0 %v1936_v0  ;;  %v1677_v0 = vld [vmem:[%s2240_s7 + $0x6] ss:$0 sm:$0xff] }
 0x803   : > { %1883 = vmatpush3.bf16.msra.mxu0 %v1927_v31 }
 0x8be   : > { %v1331_v23 = vpop.f32.mrf.mxu0 }
 0x8bf   : > { %v1332_v24 = vadd.f32 %v1664_v22, %v1331_v23 }
 0x8c0   : > { %v1858_v25 = vpop.f32.mrf.mxu0 }
 0x8c1   : > { %vm1337_vm5 = vcmp.gt.f32.partialorder %v1332_v24, 0.0  ;;  %v1338_v3 = vmul.f32 0.01, %v1332_v24 }
 0x8c2   : > { %v1334_v26 = vpop.f32.mrf.mxu0 }
 0x8c3   : > { %v1339_v27 = vsel %vm1337_vm5, %v1332_v24, %v1338_v3 }
 0x8c4   : > { %v1340_v28 = vpack.c.bf16 %v1339_v27, %v1339_v27  ;;  %v1859_v29 = vpop.f32.mrf.mxu0 }
 0x8c6   : > { %1877 = vmatmul.mubr.bf16.vlgmr.msra.gmra.mxu1 %v1340_v28 }
 0x986   : > { %v1444_v33 = vpop.f32.mrf.mxu1 }
 0x987   : > { %v1445_v34 = vadd.f32 %v1668_v32, %v1444_v33 }
 0x988   : > { %v1878_v35 = vpop.f32.mrf.mxu1 }
 0x989   : > { %vm1450_vm6 = vcmp.gt.f32.partialorder %v1445_v34, 0.0  ;;  %v1451_v36 = vmul.f32 0.01, %v1445_v34 }
 0x98a   : > { %v1447_v37 = vpop.f32.mrf.mxu1 }
 0x98b   : > { %v1452_v38 = vsel %vm1450_vm6, %v1445_v34, %v1451_v36 }
 0x98c   : > { %v1453_v39 = vpack.c.bf16 %v1452_v38, %v1452_v38  ;;  %v1879_v40 = vpop.f32.mrf.mxu1 }
 0x98e   : > { %1885 = vmatmul.mubr.msk.bf16.vlgmr.msra.gmra.mxu0 %vm602_vm4, %v1453_v39 }
 0xa4e   : > { %v1512_v41 = vpop.f32.mrf.mxu0 }
 0xa4f   : > { %v1513_v42 = vadd.f32 %v1677_v0, %v1512_v41 }
 0xa50   : > { %v1886_v43 = vpop.f32.mrf.mxu0 }
 0xa51   : > { %1519 = vst.msk [vmem:[%s368_s21] sm:$0x3] %vm1518_vm7, %v1513_v42 }
 0xa52   : > { %v1515_v44 = vpop.f32.mrf.mxu0 }
 0xa54   : > { %v1887_v45 = vpop.f32.mrf.mxu0 }
 0xa55 PF: > { %s18_s27 = sadd.s32 1, %s1934_s27  }
 0xa56   : > { %p15_p4 = scmp.ge.s32.totalorder %s18_s27, 4  }
 0xa58   :  { %17 = sbr.rel (!%p15_p4) target bundleno = 1 (0x1), region = 94 }

</bundles_post_ra>
